<compile_context>
chip_gen: v7x
topology: tpu7x:2x2x1
jax: 0.10.0
libtpu: 0.0.40
codegen_flags: <defaults>
</compile_context>

<pallas_src>
import functools

import jax
import jax.numpy as jnp
from jax.experimental import pallas as pl
from jax.experimental.pallas import tpu as pltpu


def _round_up(x, m):
    return ((x + m - 1) // m) * m


def _mlp_kernel(num_relu_layers, state_ref, action_ref, *refs):
    """refs = (W0, b0, W1, b1, ..., w_last, b_last, out).

    Transposed / lane-dense-batch layout:
      state_ref : (Ds, TB) f32      action_ref : (Da, TB) f32
      Wi        : (out_i, in_i) bf16   bi       : (out_i, 1) f32
      w_last    : (H_last, 1) f32      b_last   : (1, 1) f32
      out_ref   : (1, TB) f32
    """
    out_ref = refs[-1]
    p = refs[:-1]

    # Fused concat along the sublane (feature) axis; cast once to bf16 for the MXU.
    x = jnp.concatenate([state_ref[...], action_ref[...]], axis=0)
    h_f32 = x
    h = x.astype(jnp.bfloat16)

    # Hidden layers: single-dot Linear (W @ h), f32 accumulation, bias + ReLU in f32.
    for layer in range(num_relu_layers):
        w = p[2 * layer][...]          # (out, in) bf16
        b = p[2 * layer + 1][...]      # (out, 1)  f32
        h_f32 = jnp.maximum(
            jnp.dot(w, h, preferred_element_type=jnp.float32) + b, 0.0)
        h = h_f32.astype(jnp.bfloat16)

    # Final Linear(H_last, 1): VPU multiply + sublane reduction (kept off the MXU),
    # producing a lane-dense (1, TB) row.
    w_last = p[2 * num_relu_layers][...]        # (H_last, 1) f32
    b_last = p[2 * num_relu_layers + 1][...]    # (1, 1) f32
    q = jnp.sum(h_f32 * w_last, axis=0, keepdims=True) + b_last
    out_ref[...] = q.astype(out_ref.dtype)


def init_ddpg_critic_params(key, hidden_dim):
    """Deterministic init mirroring nn.Linear: U(-1/sqrt(fan_in), +1/sqrt(fan_in)).

    Returns a list of (w (in, out), b (1, out)) f32 pairs (reference layout)."""
    dims = list(hidden_dim) + [1]
    params = []
    for i in range(len(dims) - 1):
        fan_in, fan_out = dims[i], dims[i + 1]
        key, kw, kb = jax.random.split(key, 3)
        bound = 1.0 / jnp.sqrt(fan_in)
        w = jax.random.uniform(kw, (fan_in, fan_out), jnp.float32, -bound, bound)
        b = jax.random.uniform(kb, (1, fan_out), jnp.float32, -bound, bound)
        params.append((w, b))
    return params


def prepare_kernel_params(params):
    """Reorganize (w, b) pairs into the kernel's flat layout (once, off the hot path).

    Kernel layout: [W0 (out,in) bf16, b0 (out,1) f32, W1 bf16, b1 f32, ...,
                    w_last (H_last,1) f32, b_last (1,1) f32].
    """
    flat = []
    for (w, b) in params[:-1]:
        flat.append(jnp.asarray(w.T, jnp.bfloat16))               # (out, in) for W @ x
        flat.append(jnp.asarray(b.reshape(-1, 1), jnp.float32))   # (out, 1)
    w_last, b_last = params[-1]
    flat.append(jnp.asarray(w_last.reshape(-1, 1), jnp.float32))  # (H_last, 1)
    flat.append(jnp.asarray(b_last.reshape(1, 1), jnp.float32))   # (1, 1)
    return flat


@functools.partial(jax.jit, static_argnames=("block_batch",))
def ddpg_critic_forward(state, action, *flat_params, block_batch=1024):
    """state: (B, Ds), action: (B, Da) with Ds + Da == hidden_dim[0]. Returns (B, 1)."""
    B, ds = state.shape
    da = action.shape[1]
    num_relu_layers = (len(flat_params) - 2) // 2

    # Lane-dense layout: batch on the lane axis (wrapper-side transpose; callers
    # that already hold (D, B) data can feed the kernel directly and skip it).
    state_t = state.T     # (Ds, B)
    action_t = action.T   # (Da, B)

    # Batch tile: small batches run as one full-extent block; larger batches use
    # lane-aligned (multiple-of-128) tiles with >= 2 grid steps so the "parallel"
    # axis can be sharded across v7x's two TensorCores.
    if B <= 256:
        tb = B
    else:
        tb = min(_round_up(block_batch, 128), _round_up(pl.cdiv(B, 2), 128))
    grid = (pl.cdiv(B, tb),)   # ragged last block: no host-side padding needed

    in_specs = [
        pl.BlockSpec((ds, tb), lambda i: (0, i)),
        pl.BlockSpec((da, tb), lambda i: (0, i)),
    ]
    # Weights/biases: constant block index -> stay VMEM-resident across steps.
    for pm in flat_params:
        in_specs.append(pl.BlockSpec(pm.shape, lambda i: (0, 0)))

    out_spec = pl.BlockSpec((1, tb), lambda i: (0, i))
    out_shape = jax.ShapeDtypeStruct((1, B), jnp.float32)

    kernel = functools.partial(_mlp_kernel, num_relu_layers)
    out = pl.pallas_call(
        kernel,
        grid=grid,
        in_specs=in_specs,
        out_specs=out_spec,
        out_shape=out_shape,
        compiler_params=pltpu.CompilerParams(
            dimension_semantics=("parallel",),
        ),
    )(state_t, action_t, *flat_params)
    return out.reshape(B, 1)


def reference_forward(state, action, params):
    x = jnp.concatenate([state, action], axis=1)
    n = len(params)
    for i, (w, b) in enumerate(params):
        x = x @ w + b
        if i < n - 1:
            x = jnp.maximum(x, 0.0)
    return x


if __name__ == "__main__":
    # Small shapes consistent with the module: hidden_dim[0] = state_dim + action_dim.
    state_dim, action_dim = 24, 8
    hidden_dim = [state_dim + action_dim, 64, 32]  # Linear(32,64)+ReLU, Linear(64,32)+ReLU, Linear(32,1)

    key = jax.random.PRNGKey(0)
    k_state, k_action, k_params, k_state2, k_action2 = jax.random.split(key, 5)

    params = init_ddpg_critic_params(k_params, hidden_dim)
    flat_params = prepare_kernel_params(params)

    # Small batch: single full-extent block path.
    batch = 8
    state = jax.random.normal(k_state, (batch, state_dim), jnp.float32)
    action = jax.random.normal(k_action, (batch, action_dim), jnp.float32)
    out = jax.block_until_ready(ddpg_critic_forward(state, action, *flat_params))
    ref = reference_forward(state, action, params)
    assert out.shape == (batch, 1), out.shape
    # bf16 MXU operands (f32 accumulate) -> relaxed tolerance vs the f32 reference.
    assert jnp.allclose(out, ref, atol=2e-2, rtol=2e-2), (out, ref)

    # Larger non-multiple-of-tile batch: exercises the tiled grid + ragged last block.
    batch2 = 1000
    state2 = jax.random.normal(k_state2, (batch2, state_dim), jnp.float32)
    action2 = jax.random.normal(k_action2, (batch2, action_dim), jnp.float32)
    out2 = jax.block_until_ready(ddpg_critic_forward(state2, action2, *flat_params))
    ref2 = reference_forward(state2, action2, params)
    assert out2.shape == (batch2, 1), out2.shape
    assert jnp.allclose(out2, ref2, atol=2e-2, rtol=2e-2)

    print("KERNEL_OK")
</pallas_src>

<mosaic_0001>
module attributes {stable_mosaic.version = 11 : i64} {
  func.func @_mlp_kernel(%arg0: i32, %arg1: memref<24x8xf32, #tpu.memory_space<vmem>>, %arg2: memref<8x8xf32, #tpu.memory_space<vmem>>, %arg3: memref<64x32xbf16, #tpu.memory_space<vmem>>, %arg4: memref<64x1xf32, #tpu.memory_space<vmem>>, %arg5: memref<32x64xbf16, #tpu.memory_space<vmem>>, %arg6: memref<32x1xf32, #tpu.memory_space<vmem>>, %arg7: memref<32x1xf32, #tpu.memory_space<vmem>>, %arg8: memref<1x1xf32, #tpu.memory_space<vmem>>, %arg9: memref<1x8xf32, #tpu.memory_space<vmem>>) attributes {dimension_semantics = [#tpu.dimension_semantics<parallel>], iteration_bounds = array<i64: 1>, scalar_prefetch = 0 : i64, scratch_operands = 0 : i64, tpu.core_type = #tpu.core_type<tc>, window_params = [{transform_indices = @transform_0, window_bounds = array<i64: 24, 8>}, {transform_indices = @transform_1, window_bounds = array<i64: 8, 8>}, {pipeline_mode = #tpu.pipeline_mode<synchronous>, transform_indices = @transform_2, window_bounds = array<i64: 64, 32>}, {pipeline_mode = #tpu.pipeline_mode<synchronous>, transform_indices = @transform_3, window_bounds = array<i64: 64, 1>}, {pipeline_mode = #tpu.pipeline_mode<synchronous>, transform_indices = @transform_4, window_bounds = array<i64: 32, 64>}, {pipeline_mode = #tpu.pipeline_mode<synchronous>, transform_indices = @transform_5, window_bounds = array<i64: 32, 1>}, {pipeline_mode = #tpu.pipeline_mode<synchronous>, transform_indices = @transform_6, window_bounds = array<i64: 32, 1>}, {pipeline_mode = #tpu.pipeline_mode<synchronous>, transform_indices = @transform_7, window_bounds = array<i64: 1, 1>}, {transform_indices = @transform_8, window_bounds = array<i64: 1, 8>}]} {
    %c0 = arith.constant 0 : index
    %c0_0 = arith.constant 0 : index
    %0 = vector.load %arg1[%c0, %c0_0] : memref<24x8xf32, #tpu.memory_space<vmem>>, vector<24x8xf32>
    %c0_1 = arith.constant 0 : index
    %c0_2 = arith.constant 0 : index
    %1 = vector.load %arg2[%c0_1, %c0_2] : memref<8x8xf32, #tpu.memory_space<vmem>>, vector<8x8xf32>
    %2 = tpu.concatenate %0, %1 in 0 : vector<24x8xf32>, vector<8x8xf32> -> vector<32x8xf32>
    %3 = arith.truncf %2 : vector<32x8xf32> to vector<32x8xbf16>
    %c0_3 = arith.constant 0 : index
    %c0_4 = arith.constant 0 : index
    %4 = vector.load %arg3[%c0_3, %c0_4] : memref<64x32xbf16, #tpu.memory_space<vmem>>, vector<64x32xbf16>
    %c0_5 = arith.constant 0 : index
    %c0_6 = arith.constant 0 : index
    %5 = vector.load %arg4[%c0_5, %c0_6] : memref<64x1xf32, #tpu.memory_space<vmem>>, vector<64x1xf32>
    %cst = arith.constant dense<0.000000e+00> : vector<64x8xf32>
    %6 = tpu.matmul %4, %3, %cst {dimension_numbers = #tpu.dot_dimension_numbers<[1], [0], [0], [1], [0, 0, 1, 1], [], []>} : vector<64x32xbf16>, vector<32x8xbf16>, vector<64x8xf32> -> vector<64x8xf32>
    %7 = vector.broadcast %5 : vector<64x1xf32> to vector<64x8xf32>
    %8 = arith.addf %6, %7 : vector<64x8xf32>
    %cst_7 = arith.constant 0.000000e+00 : f32
    %9 = vector.broadcast %cst_7 : f32 to vector<64x8xf32>
    %10 = arith.maximumf %8, %9 : vector<64x8xf32>
    %11 = arith.truncf %10 : vector<64x8xf32> to vector<64x8xbf16>
    %c0_8 = arith.constant 0 : index
    %c0_9 = arith.constant 0 : index
    %12 = vector.load %arg5[%c0_8, %c0_9] : memref<32x64xbf16, #tpu.memory_space<vmem>>, vector<32x64xbf16>
    %c0_10 = arith.constant 0 : index
    %c0_11 = arith.constant 0 : index
    %13 = vector.load %arg6[%c0_10, %c0_11] : memref<32x1xf32, #tpu.memory_space<vmem>>, vector<32x1xf32>
    %cst_12 = arith.constant dense<0.000000e+00> : vector<32x8xf32>
    %14 = tpu.matmul %12, %11, %cst_12 {dimension_numbers = #tpu.dot_dimension_numbers<[1], [0], [0], [1], [0, 0, 1, 1], [], []>} : vector<32x64xbf16>, vector<64x8xbf16>, vector<32x8xf32> -> vector<32x8xf32>
    %15 = vector.broadcast %13 : vector<32x1xf32> to vector<32x8xf32>
    %16 = arith.addf %14, %15 : vector<32x8xf32>
    %cst_13 = arith.constant 0.000000e+00 : f32
    %17 = vector.broadcast %cst_13 : f32 to vector<32x8xf32>
    %18 = arith.maximumf %16, %17 : vector<32x8xf32>
    %c0_14 = arith.constant 0 : index
    %c0_15 = arith.constant 0 : index
    %19 = vector.load %arg7[%c0_14, %c0_15] : memref<32x1xf32, #tpu.memory_space<vmem>>, vector<32x1xf32>
    %c0_16 = arith.constant 0 : index
    %c0_17 = arith.constant 0 : index
    %20 = vector.load %arg8[%c0_16, %c0_17] : memref<1x1xf32, #tpu.memory_space<vmem>>, vector<1x1xf32>
    %21 = vector.broadcast %19 : vector<32x1xf32> to vector<32x8xf32>
    %22 = arith.mulf %18, %21 : vector<32x8xf32>
    %cst_18 = arith.constant dense<0.000000e+00> : vector<8xf32>
    %23 = vector.multi_reduction <add>, %22, %cst_18 [0] : vector<32x8xf32> to vector<8xf32>
    %24 = vector.shape_cast %23 : vector<8xf32> to vector<1x8xf32>
    %25 = vector.broadcast %20 : vector<1x1xf32> to vector<1x8xf32>
    %26 = arith.addf %24, %25 : vector<1x8xf32>
    %c0_19 = arith.constant 0 : index
    %c0_20 = arith.constant 0 : index
    %27 = vector.load %arg9[%c0_19, %c0_20] : memref<1x8xf32, #tpu.memory_space<vmem>>, vector<1x8xf32>
    tpu.vector_store %arg9[%c0_19, %c0_20], %26 {strides = array<i32>} : memref<1x8xf32, #tpu.memory_space<vmem>>, vector<1x8xf32>,
    return
  }
  func.func @transform_0(%arg0: i32) -> (i32, i32) {
    %c0_i32 = arith.constant 0 : i32
    %c0_i32_0 = arith.constant 0 : i32
    return %c0_i32, %arg0 : i32, i32
  }
  func.func @transform_1(%arg0: i32) -> (i32, i32) {
    %c0_i32 = arith.constant 0 : i32
    %c0_i32_0 = arith.constant 0 : i32
    return %c0_i32, %arg0 : i32, i32
  }
  func.func @transform_2(%arg0: i32) -> (i32, i32) {
    %c0_i32 = arith.constant 0 : i32
    %c0_i32_0 = arith.constant 0 : i32
    %c0_i32_1 = arith.constant 0 : i32
    return %c0_i32, %c0_i32_0 : i32, i32
  }
  func.func @transform_3(%arg0: i32) -> (i32, i32) {
    %c0_i32 = arith.constant 0 : i32
    %c0_i32_0 = arith.constant 0 : i32
    %c0_i32_1 = arith.constant 0 : i32
    return %c0_i32, %c0_i32_0 : i32, i32
  }
  func.func @transform_4(%arg0: i32) -> (i32, i32) {
    %c0_i32 = arith.constant 0 : i32
    %c0_i32_0 = arith.constant 0 : i32
    %c0_i32_1 = arith.constant 0 : i32
    return %c0_i32, %c0_i32_0 : i32, i32
  }
  func.func @transform_5(%arg0: i32) -> (i32, i32) {
    %c0_i32 = arith.constant 0 : i32
    %c0_i32_0 = arith.constant 0 : i32
    %c0_i32_1 = arith.constant 0 : i32
    return %c0_i32, %c0_i32_0 : i32, i32
  }
  func.func @transform_6(%arg0: i32) -> (i32, i32) {
    %c0_i32 = arith.constant 0 : i32
    %c0_i32_0 = arith.constant 0 : i32
    %c0_i32_1 = arith.constant 0 : i32
    return %c0_i32, %c0_i32_0 : i32, i32
  }
  func.func @transform_7(%arg0: i32) -> (i32, i32) {
    %c0_i32 = arith.constant 0 : i32
    %c0_i32_0 = arith.constant 0 : i32
    %c0_i32_1 = arith.constant 0 : i32
    return %c0_i32, %c0_i32_0 : i32, i32
  }
  func.func @transform_8(%arg0: i32) -> (i32, i32) {
    %c0_i32 = arith.constant 0 : i32
    %c0_i32_0 = arith.constant 0 : i32
    return %c0_i32, %arg0 : i32, i32
  }
}

</mosaic_0001>

<bundles_post_ra>
// kernel: ddpg_critic_forward.1
= control target key start
LH: loop header
LB: loop body
LE: loop exit
PB: predicated region body
PF: predicated region fallthrough
CT: control target
= control target key end

     0   :  { %s600_s0 = inlined_call_operand.vmem [shape: f32[24,8], index: 0, kind: input, shape index: {}]   ;;  %s601_s1 = inlined_call_operand.vmem [shape: f32[8,8], index: 1, kind: input, shape index: {}]   ;;  %s602_s2 = inlined_call_operand.vmem [shape: bf16[64,32], index: 2, kind: input, shape index: {}]   ;;  %s603_s3 = inlined_call_operand.vmem [shape: f32[64,1], index: 3, kind: input, shape index: {}]   ;;  %s604_s4 = inlined_call_operand.vmem [shape: bf16[32,64], index: 4, kind: input, shape index: {}]   ;;  %s605_s5 = inlined_call_operand.vmem [shape: f32[32,1], index: 5, kind: input, shape index: {}]   ;;  %s606_s6 = inlined_call_operand.vmem [shape: f32[32,1], index: 6, kind: input, shape index: {}]   ;;  %s607_s7 = inlined_call_operand.<no memory space> [shape: f32[1,1], index: 7, kind: input, shape index: {}]   ;;  %s608_s8 = inlined_call_operand.hbm [shape: f32[1,8], index: 8, kind: output, shape index: {}]  }
   0x1   :  { %v13_v0 = vstv %s607_s7 }
   0x2   :  { %14 = vst [vmem:[#allocation2] sm:$0x1] %v13_v0 }
   0x3   :  { %v33_v1 = vld [vmem:[%s600_s0] sm:$0xff]  ;;  %v34_v2 = vld [vmem:[%s600_s0 + $0x8] sm:$0xff]  ;;  %v35_v3 = vld [vmem:[%s600_s0 + $0x10] sm:$0xff]  ;;  %vm115_vm0 = vcmask 261120   ;;  %v454_v6 = vmov 0  }
   0x4   :  { %v37_v4 = vpack.c.bf16 %v34_v2, %v33_v1  ;;  %v36_v5 = vld [vmem:[%s601_s1] sm:$0xff]  ;;  %422 = vset.pattern.permute.xlu0 %v454_v6  ;;  %423 = vset.pattern.permute.xlu1 %v454_v6  ;;  %v49_v10 = vld [vmem:[%s603_s3 + $0x10] sm:$0xff]  ;;  %v425_v11 = vld [vmem:[%s602_s2 + $0x8] sm:$0xff]  }
   0x5   :  { %v38_v7 = vpack.c.bf16 %v36_v5, %v35_v3  ;;  %v424_v8 = vld [vmem:[%s602_s2] sm:$0xff]   ;;  %v48_v12 = vld [vmem:[%s603_s3 + $0x8] sm:$0xff]  ;;  %67 = vperm.xlu1 %423, %v49_v10   ;;  %v426_v13 = vld [vmem:[%s602_s2 + $0x10] sm:$0xff]  }
   0x6   :  { %396 = vmatprep.subr.bf16.mxu0 %v37_v4  ;;  %400 = vmatprep.mubr.msk.bf16.mxu0 %vm115_vm0, %v424_v8  ;;  %v47_v9 = vld [vmem:[%s603_s3] sm:$0xff]  ;;  %v50_v14 = vld [vmem:[%s603_s3 + $0x18] sm:$0xff]  ;;  %v52_v16 = vld [vmem:[%s603_s3 + $0x28] sm:$0xff] }
   0x7   :  { %397 = vmatpush3.bf16.msra.mxu0 %v37_v4  ;;  %57 = vperm.xlu0 %422, %v47_v9   ;;  %v51_v15 = vld [vmem:[%s603_s3 + $0x20] sm:$0xff] }
   0x8   :  { %398 = vmatprep.subr.bf16.mxu0 %v38_v7 }
   0x9   :  { %72 = vperm.xlu1 %423, %v50_v14  }
   0xb   :  { %399 = vmatpush3.bf16.msra.mxu0 %v38_v7  ;;  %62 = vperm.xlu0 %422, %v48_v12  }
   0xe   :  { %401 = vmatmul.mubr.msk.bf16.vlgmr.msra.gmra.mrb[0].mxu0 %vm115_vm0, %v425_v11 }
   0xf   :  { %404 = vmatprep.mubr.msk.bf16.mxu0 %vm115_vm0, %v426_v13 }
  0x10   :  { %15 = vsyncpa [#allocation4], 0  ;;  %77 = vperm.xlu0 %422, %v51_v15   ;;  %v427_v17 = vld [vmem:[%s602_s2 + $0x18] sm:$0xff]   ;;  %v53_v18 = vld [vmem:[%s603_s3 + $0x30] sm:$0xff]  ;;  %82 = vperm.xlu1 %423, %v52_v16   ;;  %vm243_vm1 = vcmask 523264   ;;  %vm332_vm2 = vcmask 64512  }
  0x11   :  { %v54_v19 = vld [vmem:[%s603_s3 + $0x38] sm:$0xff]  ;;  %v209_v20 = vld [vmem:[%s605_s5] sm:$0xff]  ;;  %v210_v21 = vld [vmem:[%s605_s5 + $0x8] sm:$0xff]  ;;  %vm356_vm3 = vcmask 57344  }
  0x12   :  { %v211_v22 = vld [vmem:[%s605_s5 + $0x10] sm:$0xff]  ;;  %v212_v23 = vld [vmem:[%s605_s5 + $0x18] sm:$0xff]  ;;  %v303_v24 = vld [vmem:[%s606_s6] sm:$0xff] }
  0x13   :  { %v304_v25 = vld [vmem:[%s606_s6 + $0x8] sm:$0xff]  ;;  %v305_v26 = vld [vmem:[%s606_s6 + $0x10] sm:$0xff]  ;;  %v306_v27 = vld [vmem:[%s606_s6 + $0x18] sm:$0xff] }
  0x14   :  { %87 = vperm.xlu0 %422, %v53_v18   ;;  %92 = vperm.xlu1 %423, %v54_v19   ;;  %v307_v28 = vld [vmem:[#allocation2] sm:$0x1]  ;;  %v429_v2 = vld [vmem:[%s604_s4 + $0x8] sm:$0xff]  }
  0x15   :  { %v428_v29 = vld [vmem:[%s604_s4] sm:$0xff]   ;;  %s455_s4 = smov [#allocation3]  }
  0x16   :  { %405 = vmatmul.mubr.msk.bf16.gmra.mrb[4].mxu0 %vm115_vm0, %v427_v17  ;;  %416 = vmatprep.mubr.msk.bf16.mxu1 %vm243_vm1, %v428_v29  ;;  %s364_s27 = sshll.u32 %s455_s4, 4  ;;  %s365_s27 = int_to_ptr.vmem [resolvable:$true] %s364_s27 }
  0x17   :  { %s430_s28 = scalar_lea.vmem %s365_s27, 16  ;;  %s434_s29 = scalar_lea.vmem %s365_s27, 32 }
  0x18   :  { %215 = vperm.xlu0 %422, %v209_v20   ;;  %220 = vperm.xlu1 %423, %v210_v21   ;;  %p431_p0 = scmp.ne.s32.totalorder %s365_s27, %s430_s28  ;;  %p435_p1 = scmp.lt.s32.totalorder %s365_s27, %s365_s27 }
  0x19   :  { %p436_p2 = scmp.lt.s32.totalorder %s434_s29, %s430_s28 }
  0x1b   :  { %p437_p3 = por %p436_p2, %p435_p1 }
  0x1c   :  { %225 = vperm.xlu0 %422, %v211_v22   ;;  %230 = vperm.xlu1 %423, %v212_v23  }
  0x1d   :  { %p438_p4 = pnand %p437_p3, %p431_p0 }
  0x20   :  { %310 = vperm.xlu0 %422, %v303_v24   ;;  %315 = vperm.xlu1 %423, %v304_v25  }
  0x24   :  { %320 = vperm.xlu0 %422, %v305_v26   ;;  %325 = vperm.xlu1 %423, %v306_v27  }
  0x28   :  { %348 = vperm.xlu0 %422, %v307_v28  }
  0x84   :  { %v68_v31 = vpop.permute.xlu1 %67 }
  0x86   :  { %v58_v30 = vpop.permute.xlu0 %57 }
  0x88   :  { %v73_v33 = vpop.permute.xlu1 %72 }
  0x8a   :  { %v63_v32 = vpop.permute.xlu0 %62 }
  0x8f   :  { %v78_v37 = vpop.permute.xlu0 %77  ;;  %v83_v42 = vpop.permute.xlu1 %82 }
  0x93   :  { %v88_v49 = vpop.permute.xlu0 %87  ;;  %v93_v54 = vpop.permute.xlu1 %92 }
  0x97   :  { %v216_v3 = vpop.permute.xlu0 %215  ;;  %v221_v4 = vpop.permute.xlu1 %220 }
  0x9b   :  { %v226_v5 = vpop.permute.xlu0 %225  ;;  %v231_v6 = vpop.permute.xlu1 %230 }
  0x9f   :  { %v311_v8 = vpop.permute.xlu0 %310  ;;  %v316_v13 = vpop.permute.xlu1 %315 }
  0xa3   :  { %v321_v22 = vpop.permute.xlu0 %320  ;;  %v326_v25 = vpop.permute.xlu1 %325 }
  0xe1   :  { %v402_v34 = vpop.f32.mrb[0].mxu0 }
  0xe2   :  { %v171_v35 = vadd.f32 %v402_v34, %v68_v31  ;;  %v162_v36 = vpop.f32.mrb[1].mxu0 }
  0xe3   :  { %v163_v38 = vadd.f32 %v162_v36, %v58_v30  ;;  %v403_v39 = vpop.f32.mrb[2].mxu0 }
  0xe4   :  { %v174_v40 = vadd.f32 %v403_v39, %v73_v33  ;;  %v165_v41 = vpop.f32.mrb[3].mxu0  ;;  %v195_v44 = vmax.f32 %v171_v35, 0.0  ;;  %v351_v33 = vlaneseq }
  0xe5   :  { %v166_v43 = vadd.f32 %v165_v41, %v63_v32  ;;  %v193_v46 = vmax.f32 %v163_v38, 0.0  ;;  %v349_v41 = vpop.permute.xlu0 %348 }
  0xe6   :  { %v196_v45 = vmax.f32 %v174_v40, 0.0  ;;  %v352_v36 = vshrl.u32 %v351_v33, 7 }
  0xe7   :  { %v194_v47 = vmax.f32 %v166_v43, 0.0 }
  0xe8   :  { %v202_v48 = vpack.c.bf16 %v196_v45, %v195_v44  ;;  %v353_v39 = vsub.s32 0, %v352_v36 }
  0xe9   :  { %v406_v50 = vpop.f32.mrb[4].mxu0  ;;  %v201_v51 = vpack.c.bf16 %v194_v47, %v193_v46 }
  0xea   :  { %v187_v52 = vadd.f32 %v406_v50, %v88_v49  ;;  %v178_v53 = vpop.f32.mrb[5].mxu0  ;;  %v354_v43 = vrot.slane %v349_v41, %v353_v39 }
  0xeb   :  { %v179_v55 = vadd.f32 %v178_v53, %v78_v37  ;;  %v407_v56 = vpop.f32.mrb[6].mxu0  ;;  %408 = vmatprep.subr.bf16.mxu1 %v201_v51 }
  0xec   :  { %v190_v57 = vadd.f32 %v407_v56, %v93_v54  ;;  %v181_v58 = vpop.f32.mrb[7].mxu0  ;;  %409 = vmatpush3.bf16.msra.mxu1 %v201_v51  ;;  %v199_v60 = vmax.f32 %v187_v52, 0.0 }
  0xed   :  { %v182_v59 = vadd.f32 %v181_v58, %v83_v42  ;;  %410 = vmatprep.subr.bf16.mxu1 %v202_v48  ;;  %v197_v62 = vmax.f32 %v179_v55, 0.0 }
  0xee   :  { %v200_v61 = vmax.f32 %v190_v57, 0.0 }
  0xef   :  { %v198_v63 = vmax.f32 %v182_v59, 0.0 }
  0xf0   :  { %v204_v0 = vpack.c.bf16 %v200_v61, %v199_v60  ;;  %411 = vmatpush3.bf16.msra.mxu1 %v202_v48 }
  0xf1   :  { %v203_v1 = vpack.c.bf16 %v198_v63, %v197_v62 }
  0xf3   :  { %412 = vmatprep.subr.bf16.mxu1 %v203_v1 }
  0xf4   :  { %413 = vmatpush3.bf16.msra.mxu1 %v203_v1 }
  0xf5   :  { %414 = vmatprep.subr.bf16.mxu1 %v204_v0 }
  0xf8   :  { %415 = vmatpush3.bf16.msra.mxu1 %v204_v0 }
  0xfb   :  { %417 = vmatmul.mubr.msk.bf16.vlgmr.msra.gmra.mrb[0].mxu1 %vm243_vm1, %v429_v2 }
 0x1ce   :  { %v418_v7 = vpop.f32.mrb[0].mxu1 }
 0x1cf   :  { %v293_v9 = vadd.f32 %v418_v7, %v226_v5  ;;  %v284_v10 = vpop.f32.mrb[1].mxu1 }
 0x1d0   :  { %v285_v11 = vadd.f32 %v284_v10, %v216_v3  ;;  %v419_v12 = vpop.f32.mrb[2].mxu1 }
 0x1d1   :  { %v296_v14 = vadd.f32 %v419_v12, %v231_v6  ;;  %v287_v15 = vpop.f32.mrb[3].mxu1  ;;  %v301_v16 = vmax.f32 %v293_v9, 0.0 }
 0x1d2   :  { %v299_v17 = vmax.f32 %v285_v11, 0.0  ;;  %v288_v18 = vadd.f32 %v287_v15, %v221_v4 }
 0x1d3   :  { %v302_v20 = vmax.f32 %v296_v14, 0.0  ;;  %v330_v23 = vmul.f32 %v321_v22, %v301_v16 }
 0x1d4   :  { %v328_v19 = vmul.f32 %v311_v8, %v299_v17  ;;  %v300_v21 = vmax.f32 %v288_v18, 0.0 }
 0x1d5   :  { %v331_v27 = vmul.f32 %v326_v25, %v302_v20  ;;  %v336_v30 = vsel %vm332_vm2, %v330_v23, 0.0 }
 0x1d6   :  { %v329_v24 = vmul.f32 %v316_v13, %v300_v21  ;;  %v333_v26 = vsel %vm332_vm2, %v328_v19, 0.0 }
 0x1d7   :  { %v338_v32 = vsel %vm332_vm2, %v331_v27, 0.0 }
 0x1d8   :  { %v334_v28 = vsel %vm332_vm2, %v329_v24, 0.0 }
 0x1d9   :  { %v335_v29 = vadd.f32 %v334_v28, %v333_v26 }
 0x1db   :  { %v337_v31 = vadd.f32 %v336_v30, %v335_v29 }
 0x1dd   :  { %v339_v34 = vadd.f32 %v338_v32, %v337_v31 }
 0x1df   :  { %v340_v35 = vrot.slane %v339_v34, 4 }
 0x1e1   :  { %v341_v37 = vadd.f32 %v340_v35, %v339_v34 }
 0x1e3   :  { %v342_v38 = vrot.slane %v341_v37, 2 }
 0x1e5   :  { %v343_v40 = vadd.f32 %v342_v38, %v341_v37 }
 0x1e7   :  { %v344_v42 = vrot.slane %v343_v40, 1 }
 0x1e9   :  { %v345_v44 = vadd.f32 %v344_v42, %v343_v40 }
 0x1eb   :  { %v355_v45 = vadd.f32 %v354_v43, %v345_v44 }
 0x1ed   :  { %357 = vst.msk [vmem:[#allocation3] sm:$0x1] %vm356_vm3, %v355_v45 }
 0x1ee   :  { %441 = shalt.err (!%p438_p4)
}
 0x1ef   :  { %s442_s10 = scalar_lea.hbm %s608_s8, 16 }
 0x1f0   :  { %p443_p5 = scmp.ne.s32.totalorder %s608_s8, %s442_s10  ;;  %p446_p6 = scmp.lt.u32.totalorder %s442_s10, %s608_s8 }
 0x1f2   :  { %p448_p7 = pnand %p446_p6, %p443_p5 }
 0x1f4   :  { %451 = shalt.err (!%p448_p7)
}
 0x1f5   :  { %367 = dma.vmem_to_hbm [thread:$0]  %s365_s27, 16, %s608_s8, [#allocation4]  }
 0x1f6   :  { %452 = dma.done.wait [#allocation4], 16  }
 0x1f7   :  { %453 = vsyncadd [#allocation4], 4294967280 }
 0x1f8   :  { %371 = vsyncpa [#allocation4], 1 }

</bundles_post_ra>
